<compile_context>
chip_gen: v7x
topology: tpu7x:2x2x1
jax: 0.10.0
libtpu: 0.0.40
codegen_flags: <defaults>
</compile_context>

<pallas_src>
import functools

import jax
import jax.numpy as jnp
from jax.experimental import pallas as pl
from jax.experimental.pallas import tpu as pltpu


def _causal_conv1d_kernel(x_ref, w_ref, b_ref, o_ref, halo_ref, *,
                          kernel_size, dilation, cin, b_sub, save_halo):
    # x_ref:    (B*Cin, TT)    packed input tile (batch group on sublanes)
    # w_ref:    (Cout, Cin*K)  column ci*K + k  ==  weight[:, ci, k]
    # b_ref:    (Cout, 1)
    # o_ref:    (B, Cout, TT)  lane-dense output tile
    # halo_ref: (B*Cin, pad)   last `pad` input columns of the previous tile
    tt = x_ref.shape[-1]
    cout = o_ref.shape[1]
    k_sz = kernel_size
    pad = dilation * (k_sz - 1)

    # Causal left padding: zero the halo at the first time tile of each group.
    @pl.when(pl.program_id(1) == 0)
    def _():
        halo_ref[...] = jnp.zeros_like(halo_ref)

    # (B*Cin, pad+TT) window covering global times [t0 - pad, t0 + TT).
    # One f32 up-cast per tile (not per tap).
    x_win = jnp.concatenate([halo_ref[...], x_ref[...]], axis=-1)
    x_win = x_win.astype(jnp.float32)
    w_f32 = w_ref[...].astype(jnp.float32)              # hoisted out of tap loops
    bias_tile = jnp.broadcast_to(b_ref[...].astype(jnp.float32), (cout, tt))

    for b in range(b_sub):                               # static unroll (B small)
        acc = bias_tile                                  # bias folds into the init
        for ci in range(cin):                            # static unroll (Cin small)
            row = x_win[b * cin + ci:b * cin + ci + 1, :]          # (1, pad+TT)
            # One sublane broadcast per (b, ci) instead of one per tap.
            row_b = jnp.broadcast_to(row, (cout, pad + tt))        # (Cout, pad+TT)
            for k in range(k_sz):                        # static unroll (K small)
                w_col = w_f32[:, ci * k_sz + k:ci * k_sz + k + 1]  # (Cout, 1)
                off = k * dilation
                # rank-1 VPU FMA: (Cout,1) * (Cout,TT) slice; no MXU involved.
                acc = acc + w_col * row_b[:, off:off + tt]
        o_ref[b, :, :] = acc.astype(o_ref.dtype)

    if save_halo:  # static: only needed when there is more than one time tile
        halo_ref[...] = x_ref[:, tt - pad:]


def _pick_batch_fold(n, *, max_fold=8, min_groups=2):
    """Largest divisor of n (<= max_fold) that keeps >= min_groups groups, so the
    'parallel' batch-group grid axis can still be split across v7x's 2 TCs."""
    best = 1
    for d in range(2, max_fold + 1):
        if n % d == 0 and n // d >= min_groups:
            best = d
    return best


def causal_conv1d(x_nct, weight, bias, *, kernel_size, stride=1, dilation=1,
                  groups=1, time_tile=2048):
    """Forward pass of CausalConv1d.

    x_nct:  (N, Cin, T)      -- PyTorch Conv1d layout (kept as-is)
    weight: (Cout, Cin, K)   -- PyTorch Conv1d weight layout
    bias:   (Cout,)
    returns (N, Cout, T)
    """
    # TODO(synk): stride > 1 and groups > 1 paths of nn.Conv1d not implemented.
    assert stride == 1 and groups == 1
    assert kernel_size > 2          # mirrors the PyTorch module's own assert

    N, Cin, T = x_nct.shape
    Cout = weight.shape[0]
    K = kernel_size
    pad = dilation * (K - 1)

    # Time tiling (lane axis): one full-length tile when T is small, otherwise
    # `time_tile` (multiple of 128) with a Pallas-masked partial last tile.
    if T <= time_tile:
        TT = T
    else:
        assert time_tile % 128 == 0
        TT = time_tile
    Tt = pl.cdiv(T, TT)
    if Tt > 1:
        assert pad <= TT, "halo carry requires pad <= time tile"

    # Batch-group fold: pack B_sub batch elements onto the sublane axis of the
    # input via a free (contiguous) reshape, giving bigger & denser blocks and
    # B_sub x fewer grid steps.
    B_sub = _pick_batch_fold(N)
    G = N // B_sub
    x_in = x_nct.reshape(G, B_sub * Cin, T)   # metadata-only reshape

    w2 = weight.reshape(Cout, Cin * K)   # column ci*K + k == weight[:, ci, k]
    b2 = bias.reshape(Cout, 1)

    kern = functools.partial(_causal_conv1d_kernel, kernel_size=K,
                             dilation=dilation, cin=Cin, b_sub=B_sub,
                             save_halo=Tt > 1)

    itemsize = x_nct.dtype.itemsize
    cost = pl.CostEstimate(
        flops=2 * N * T * Cin * Cout * K,
        transcendentals=0,
        bytes_accessed=(x_nct.size * itemsize
                        + weight.size * weight.dtype.itemsize
                        + bias.size * bias.dtype.itemsize
                        + N * Cout * T * itemsize),
    )

    out = pl.pallas_call(
        kern,
        out_shape=jax.ShapeDtypeStruct((N, Cout, T), x_nct.dtype),
        grid_spec=pltpu.PrefetchScalarGridSpec(
            num_scalar_prefetch=0,
            # Time must stay the innermost (fastest-varying, "arbitrary") grid
            # axis: the halo scratch is carried between consecutive time tiles
            # of one batch group and reset at t == 0.
            grid=(G, Tt),
            in_specs=[
                pl.BlockSpec((pl.Squeezed(), B_sub * Cin, TT),
                             lambda g, t: (g, 0, t)),
                pl.BlockSpec((Cout, Cin * K), lambda g, t: (0, 0)),
                pl.BlockSpec((Cout, 1), lambda g, t: (0, 0)),
            ],
            out_specs=pl.BlockSpec((B_sub, Cout, TT), lambda g, t: (g, 0, t)),
            scratch_shapes=[pltpu.VMEM((B_sub * Cin, pad), x_nct.dtype)],
        ),
        compiler_params=pltpu.CompilerParams(
            dimension_semantics=("parallel", "arbitrary")),
        cost_estimate=cost,
    )(x_in, w2, b2)

    return out


def _reference(x, weight, bias, *, kernel_size, dilation=1):
    """Pure-JAX reference (same math as the PyTorch module)."""
    N, Cin, T = x.shape
    pad = dilation * (kernel_size - 1)
    xp = jnp.pad(x, ((0, 0), (0, 0), (pad, 0))).astype(jnp.float32)
    y = jnp.zeros((N, weight.shape[0], T), jnp.float32)
    for k in range(kernel_size):
        off = k * dilation
        y = y + jnp.einsum("oi,nit->not", weight[:, :, k].astype(jnp.float32),
                           xp[:, :, off:off + T])
    return (y + bias[None, :, None]).astype(x.dtype)


if __name__ == "__main__":
    key = jax.random.PRNGKey(0)

    def init_params(k, cin, cout, ks):
        kw, kb = jax.random.split(k)
        bound = 1.0 / float(cin * ks) ** 0.5
        w = jax.random.uniform(kw, (cout, cin, ks), minval=-bound, maxval=bound,
                               dtype=jnp.float32)
        b = jax.random.uniform(kb, (cout,), minval=-bound, maxval=bound,
                               dtype=jnp.float32)
        return w, b

    k1, k2, kx1, kx2 = jax.random.split(key, 4)
    ok = True

    # Case 1: module-default-ish shapes (batch=2, 4->6 ch, T=16, K=3); single
    # time tile, no batch fold (keeps 2 parallel batch groups).
    w1, b1 = init_params(k1, 4, 6, 3)
    x1 = jax.random.normal(kx1, (2, 4, 16), dtype=jnp.float32)
    y1 = jax.block_until_ready(causal_conv1d(x1, w1, b1, kernel_size=3))
    r1 = _reference(x1, w1, b1, kernel_size=3, dilation=1)
    ok &= (y1.shape == (2, 6, 16)) and bool(
        jnp.allclose(y1, r1, atol=1e-5, rtol=1e-5))

    # Case 2: dilation + batch fold (N=8 -> B_sub=4, 2 parallel groups) +
    # multiple time tiles with a ragged (partial) last tile and halo carry,
    # with no wrapper-side padding or slicing.
    w2_, b2_ = init_params(k2, 4, 6, 5)
    x2 = jax.random.normal(kx2, (8, 4, 200), dtype=jnp.float32)
    y2 = jax.block_until_ready(
        causal_conv1d(x2, w2_, b2_, kernel_size=5, dilation=2, time_tile=128))
    r2 = _reference(x2, w2_, b2_, kernel_size=5, dilation=2)
    ok &= (y2.shape == (8, 6, 200)) and bool(
        jnp.allclose(y2, r2, atol=1e-5, rtol=1e-5))

    assert ok, "mismatch vs reference"
    print("KERNEL_OK")
</pallas_src>

<mosaic_0001>
module attributes {stable_mosaic.version = 11 : i64} {
  func.func @_causal_conv1d_kernel(%arg0: i32, %arg1: i32, %arg2: memref<1x4x16xf32, #tpu.memory_space<vmem>>, %arg3: memref<6x12xf32, #tpu.memory_space<vmem>>, %arg4: memref<6x1xf32, #tpu.memory_space<vmem>>, %arg5: memref<1x6x16xf32, #tpu.memory_space<vmem>>, %arg6: memref<4x2xf32, #tpu.memory_space<vmem>>) attributes {dimension_semantics = [#tpu.dimension_semantics<parallel>, #tpu.dimension_semantics<arbitrary>], iteration_bounds = array<i64: 2, 1>, scalar_prefetch = 0 : i64, scratch_operands = 1 : i64, tpu.core_type = #tpu.core_type<tc>, window_params = [{transform_indices = @transform_0, window_bounds = array<i64: 1, 4, 16>}, {pipeline_mode = #tpu.pipeline_mode<synchronous>, transform_indices = @transform_1, window_bounds = array<i64: 6, 12>}, {pipeline_mode = #tpu.pipeline_mode<synchronous>, transform_indices = @transform_2, window_bounds = array<i64: 6, 1>}, {transform_indices = @transform_3, window_bounds = array<i64: 1, 6, 16>}]} {
    %c0_i32 = arith.constant 0 : i32
    %0 = arith.cmpi eq, %arg1, %c0_i32 : i32
    %1 = arith.extui %0 : i1 to i32
    %c0_i32_0 = arith.constant 0 : i32
    %2 = arith.cmpi ne, %1, %c0_i32_0 : i32
    scf.if %2 {
      %cst = arith.constant 0.000000e+00 : f32
      %86 = vector.broadcast %cst : f32 to vector<4x2xf32>
      %c0_12 = arith.constant 0 : index
      %c0_13 = arith.constant 0 : index
      %87 = vector.load %arg6[%c0_12, %c0_13] : memref<4x2xf32, #tpu.memory_space<vmem>>, vector<4x2xf32>
      tpu.vector_store %arg6[%c0_12, %c0_13], %86 {strides = array<i32>} : memref<4x2xf32, #tpu.memory_space<vmem>>, vector<4x2xf32>,
    } else {
    }
    %c0 = arith.constant 0 : index
    %c0_1 = arith.constant 0 : index
    %3 = vector.load %arg6[%c0, %c0_1] : memref<4x2xf32, #tpu.memory_space<vmem>>, vector<4x2xf32>
    %c0_2 = arith.constant 0 : index
    %c0_3 = arith.constant 0 : index
    %c0_4 = arith.constant 0 : index
    %4 = vector.load %arg2[%c0_2, %c0_3, %c0_4] : memref<1x4x16xf32, #tpu.memory_space<vmem>>, vector<1x4x16xf32>
    %5 = vector.shape_cast %4 : vector<1x4x16xf32> to vector<4x16xf32>
    %6 = tpu.concatenate %3, %5 in 1 : vector<4x2xf32>, vector<4x16xf32> -> vector<4x18xf32>
    %c0_5 = arith.constant 0 : index
    %c0_6 = arith.constant 0 : index
    %7 = vector.load %arg3[%c0_5, %c0_6] : memref<6x12xf32, #tpu.memory_space<vmem>>, vector<6x12xf32>
    %c0_7 = arith.constant 0 : index
    %c0_8 = arith.constant 0 : index
    %8 = vector.load %arg4[%c0_7, %c0_8] : memref<6x1xf32, #tpu.memory_space<vmem>>, vector<6x1xf32>
    %9 = vector.shape_cast %8 : vector<6x1xf32> to vector<6x1xf32>
    %10 = vector.broadcast %9 : vector<6x1xf32> to vector<6x16xf32>
    %11 = vector.extract_strided_slice %6 {offsets = [0, 0], sizes = [1, 18], strides = [1, 1]} : vector<4x18xf32> to vector<1x18xf32>
    %12 = vector.shape_cast %11 : vector<1x18xf32> to vector<1x18xf32>
    %13 = vector.broadcast %12 : vector<1x18xf32> to vector<6x18xf32>
    %14 = vector.extract_strided_slice %7 {offsets = [0, 0], sizes = [6, 1], strides = [1, 1]} : vector<6x12xf32> to vector<6x1xf32>
    %15 = vector.extract_strided_slice %13 {offsets = [0, 0], sizes = [6, 16], strides = [1, 1]} : vector<6x18xf32> to vector<6x16xf32>
    %16 = vector.broadcast %14 : vector<6x1xf32> to vector<6x16xf32>
    %17 = arith.mulf %16, %15 : vector<6x16xf32>
    %18 = arith.addf %10, %17 : vector<6x16xf32>
    %19 = vector.extract_strided_slice %7 {offsets = [0, 1], sizes = [6, 1], strides = [1, 1]} : vector<6x12xf32> to vector<6x1xf32>
    %20 = vector.extract_strided_slice %13 {offsets = [0, 1], sizes = [6, 16], strides = [1, 1]} : vector<6x18xf32> to vector<6x16xf32>
    %21 = vector.broadcast %19 : vector<6x1xf32> to vector<6x16xf32>
    %22 = arith.mulf %21, %20 : vector<6x16xf32>
    %23 = arith.addf %18, %22 : vector<6x16xf32>
    %24 = vector.extract_strided_slice %7 {offsets = [0, 2], sizes = [6, 1], strides = [1, 1]} : vector<6x12xf32> to vector<6x1xf32>
    %25 = vector.extract_strided_slice %13 {offsets = [0, 2], sizes = [6, 16], strides = [1, 1]} : vector<6x18xf32> to vector<6x16xf32>
    %26 = vector.broadcast %24 : vector<6x1xf32> to vector<6x16xf32>
    %27 = arith.mulf %26, %25 : vector<6x16xf32>
    %28 = arith.addf %23, %27 : vector<6x16xf32>
    %29 = vector.extract_strided_slice %6 {offsets = [1, 0], sizes = [1, 18], strides = [1, 1]} : vector<4x18xf32> to vector<1x18xf32>
    %30 = vector.shape_cast %29 : vector<1x18xf32> to vector<1x18xf32>
    %31 = vector.broadcast %30 : vector<1x18xf32> to vector<6x18xf32>
    %32 = vector.extract_strided_slice %7 {offsets = [0, 3], sizes = [6, 1], strides = [1, 1]} : vector<6x12xf32> to vector<6x1xf32>
    %33 = vector.extract_strided_slice %31 {offsets = [0, 0], sizes = [6, 16], strides = [1, 1]} : vector<6x18xf32> to vector<6x16xf32>
    %34 = vector.broadcast %32 : vector<6x1xf32> to vector<6x16xf32>
    %35 = arith.mulf %34, %33 : vector<6x16xf32>
    %36 = arith.addf %28, %35 : vector<6x16xf32>
    %37 = vector.extract_strided_slice %7 {offsets = [0, 4], sizes = [6, 1], strides = [1, 1]} : vector<6x12xf32> to vector<6x1xf32>
    %38 = vector.extract_strided_slice %31 {offsets = [0, 1], sizes = [6, 16], strides = [1, 1]} : vector<6x18xf32> to vector<6x16xf32>
    %39 = vector.broadcast %37 : vector<6x1xf32> to vector<6x16xf32>
    %40 = arith.mulf %39, %38 : vector<6x16xf32>
    %41 = arith.addf %36, %40 : vector<6x16xf32>
    %42 = vector.extract_strided_slice %7 {offsets = [0, 5], sizes = [6, 1], strides = [1, 1]} : vector<6x12xf32> to vector<6x1xf32>
    %43 = vector.extract_strided_slice %31 {offsets = [0, 2], sizes = [6, 16], strides = [1, 1]} : vector<6x18xf32> to vector<6x16xf32>
    %44 = vector.broadcast %42 : vector<6x1xf32> to vector<6x16xf32>
    %45 = arith.mulf %44, %43 : vector<6x16xf32>
    %46 = arith.addf %41, %45 : vector<6x16xf32>
    %47 = vector.extract_strided_slice %6 {offsets = [2, 0], sizes = [1, 18], strides = [1, 1]} : vector<4x18xf32> to vector<1x18xf32>
    %48 = vector.shape_cast %47 : vector<1x18xf32> to vector<1x18xf32>
    %49 = vector.broadcast %48 : vector<1x18xf32> to vector<6x18xf32>
    %50 = vector.extract_strided_slice %7 {offsets = [0, 6], sizes = [6, 1], strides = [1, 1]} : vector<6x12xf32> to vector<6x1xf32>
    %51 = vector.extract_strided_slice %49 {offsets = [0, 0], sizes = [6, 16], strides = [1, 1]} : vector<6x18xf32> to vector<6x16xf32>
    %52 = vector.broadcast %50 : vector<6x1xf32> to vector<6x16xf32>
    %53 = arith.mulf %52, %51 : vector<6x16xf32>
    %54 = arith.addf %46, %53 : vector<6x16xf32>
    %55 = vector.extract_strided_slice %7 {offsets = [0, 7], sizes = [6, 1], strides = [1, 1]} : vector<6x12xf32> to vector<6x1xf32>
    %56 = vector.extract_strided_slice %49 {offsets = [0, 1], sizes = [6, 16], strides = [1, 1]} : vector<6x18xf32> to vector<6x16xf32>
    %57 = vector.broadcast %55 : vector<6x1xf32> to vector<6x16xf32>
    %58 = arith.mulf %57, %56 : vector<6x16xf32>
    %59 = arith.addf %54, %58 : vector<6x16xf32>
    %60 = vector.extract_strided_slice %7 {offsets = [0, 8], sizes = [6, 1], strides = [1, 1]} : vector<6x12xf32> to vector<6x1xf32>
    %61 = vector.extract_strided_slice %49 {offsets = [0, 2], sizes = [6, 16], strides = [1, 1]} : vector<6x18xf32> to vector<6x16xf32>
    %62 = vector.broadcast %60 : vector<6x1xf32> to vector<6x16xf32>
    %63 = arith.mulf %62, %61 : vector<6x16xf32>
    %64 = arith.addf %59, %63 : vector<6x16xf32>
    %65 = vector.extract_strided_slice %6 {offsets = [3, 0], sizes = [1, 18], strides = [1, 1]} : vector<4x18xf32> to vector<1x18xf32>
    %66 = vector.shape_cast %65 : vector<1x18xf32> to vector<1x18xf32>
    %67 = vector.broadcast %66 : vector<1x18xf32> to vector<6x18xf32>
    %68 = vector.extract_strided_slice %7 {offsets = [0, 9], sizes = [6, 1], strides = [1, 1]} : vector<6x12xf32> to vector<6x1xf32>
    %69 = vector.extract_strided_slice %67 {offsets = [0, 0], sizes = [6, 16], strides = [1, 1]} : vector<6x18xf32> to vector<6x16xf32>
    %70 = vector.broadcast %68 : vector<6x1xf32> to vector<6x16xf32>
    %71 = arith.mulf %70, %69 : vector<6x16xf32>
    %72 = arith.addf %64, %71 : vector<6x16xf32>
    %73 = vector.extract_strided_slice %7 {offsets = [0, 10], sizes = [6, 1], strides = [1, 1]} : vector<6x12xf32> to vector<6x1xf32>
    %74 = vector.extract_strided_slice %67 {offsets = [0, 1], sizes = [6, 16], strides = [1, 1]} : vector<6x18xf32> to vector<6x16xf32>
    %75 = vector.broadcast %73 : vector<6x1xf32> to vector<6x16xf32>
    %76 = arith.mulf %75, %74 : vector<6x16xf32>
    %77 = arith.addf %72, %76 : vector<6x16xf32>
    %78 = vector.extract_strided_slice %7 {offsets = [0, 11], sizes = [6, 1], strides = [1, 1]} : vector<6x12xf32> to vector<6x1xf32>
    %79 = vector.extract_strided_slice %67 {offsets = [0, 2], sizes = [6, 16], strides = [1, 1]} : vector<6x18xf32> to vector<6x16xf32>
    %80 = vector.broadcast %78 : vector<6x1xf32> to vector<6x16xf32>
    %81 = arith.mulf %80, %79 : vector<6x16xf32>
    %82 = arith.addf %77, %81 : vector<6x16xf32>
    %c0_9 = arith.constant 0 : index
    %c0_10 = arith.constant 0 : index
    %c0_11 = arith.constant 0 : index
    %83 = vector.load %arg5[%c0_9, %c0_10, %c0_11] : memref<1x6x16xf32, #tpu.memory_space<vmem>>, vector<1x6x16xf32>
    %84 = vector.shape_cast %83 : vector<1x6x16xf32> to vector<6x16xf32>
    %85 = vector.shape_cast %82 : vector<6x16xf32> to vector<1x6x16xf32>
    tpu.vector_store %arg5[%c0_9, %c0_10, %c0_11], %85 {strides = array<i32>} : memref<1x6x16xf32, #tpu.memory_space<vmem>>, vector<1x6x16xf32>,
    return
  }
  func.func @transform_0(%arg0: i32, %arg1: i32) -> (i32, i32, i32) {
    %c0_i32 = arith.constant 0 : i32
    %c0_i32_0 = arith.constant 0 : i32
    return %arg0, %c0_i32, %arg1 : i32, i32, i32
  }
  func.func @transform_1(%arg0: i32, %arg1: i32) -> (i32, i32) {
    %c0_i32 = arith.constant 0 : i32
    %c0_i32_0 = arith.constant 0 : i32
    %c0_i32_1 = arith.constant 0 : i32
    return %c0_i32, %c0_i32_0 : i32, i32
  }
  func.func @transform_2(%arg0: i32, %arg1: i32) -> (i32, i32) {
    %c0_i32 = arith.constant 0 : i32
    %c0_i32_0 = arith.constant 0 : i32
    %c0_i32_1 = arith.constant 0 : i32
    return %c0_i32, %c0_i32_0 : i32, i32
  }
  func.func @transform_3(%arg0: i32, %arg1: i32) -> (i32, i32, i32) {
    %c0_i32 = arith.constant 0 : i32
    %c0_i32_0 = arith.constant 0 : i32
    return %arg0, %c0_i32, %arg1 : i32, i32, i32
  }
}

</mosaic_0001>

<bundles_post_ra>
// kernel: tpu_custom_call.1
= control target key start
LH: loop header
LB: loop body
LE: loop exit
PB: predicated region body
PF: predicated region fallthrough
CT: control target
= control target key end

     0   :  { %8 = vsyncpa [#allocation4], 0  ;;  %s609_s12 = smov 0   ;;  %s611_s13 = smov 0   ;;  %s710_s0 = inlined_call_operand.vmem [shape: f32[2,4,16], index: 0, kind: input, shape index: {}]   ;;  %s711_s1 = inlined_call_operand.hbm [shape: f32[6,12], index: 1, kind: input, shape index: {}]   ;;  %s712_s2 = inlined_call_operand.vmem [shape: f32[6,1], index: 2, kind: input, shape index: {}]   ;;  %s713_s3 = inlined_call_operand.vmem [shape: f32[2,6,16], index: 3, kind: output, shape index: {}]  }
   0x1   :  { %s613_s14 = smov 0  }
   0x2 LB: > { %s441_s15 = sadd.s32 4294967295, %s570_s14   ;;  %s26_s16 = sadd.s32 1, %s566_s13  ;;  %s570_s14 = sphi %s613_s14, %s14_s14   ;;  %s566_s13 = sphi %s611_s13, %s723_s13   ;;  %s562_s12 = sphi %s609_s12, %s722_s12  }
   0x3   : > { %p28_p0 = scmp.ge.s32.totalorder %s26_s16, 2  ;;  %p443_p1 = scmp.ge.s32.totalorder %s570_s14, 1 }
   0x4   : > { %p129_p2 = scmp.lt.s32.totalorder %s570_s14, 3  ;;  %p634_p4 = scmp.eq.s32.totalorder %s441_s15, 0 }
   0x5   : > { %s725_s16 = smov (%p28_p0, %s26_s16), 0  ;;  %s572_s19 = smov [#allocation3]  }
   0x6   : > { %p630_p3 = pnand %p443_p1, %p129_p2  ;;  %s142_s20 = sshll.u32 %s572_s19, 4  ;;  %s143_s20 = int_to_ptr.vmem [resolvable:$true] %s142_s20 }
   0x7   : > { %s718_s18 = scalar_select %p634_p4, 1, 0 }
   0x8   : > { %s717_s17 = scalar_select %p630_p3, 1, 0 }
   0x9   : > { %p456_p5 = pneg %p630_p3  ;;  %s516_s24 = scalar_lea.hbm %s711_s1, 128 }
   0xa   : > { %p517_p7 = scmp.ne.s32.totalorder %s711_s1, %s516_s24  ;;  %p523_p11 = scmp.lt.u32.totalorder %s516_s24, %s711_s1 }
   0xb   : > { %p642_p6 = pnand %p634_p4, %p456_p5 }
   0xd   : > { %p518_p8 = pneg %p642_p6 }
   0xf   : > { %p519_p9 = pnand %p518_p8, %p517_p7 }
  0x11   : > { %p520_p10 = pneg %p519_p9 }
  0x13   : > { %p525_p12 = pnand %p523_p11, %p520_p10 }
  0x15   : > { %528 = shalt.err (!%p525_p12)
}
  0x16   : > { %s529_s29 = scalar_lea.vmem %s143_s20, 128  ;;  %p537_p2 = scmp.lt.s32.totalorder %s143_s20, %s143_s20 }
  0x17   : > { %p530_p13 = scmp.ne.s32.totalorder %s143_s20, %s529_s29  ;;  %p538_p5 = scmp.lt.s32.totalorder %s529_s29, %s529_s29 }
  0x19   : > { %p532_p0 = pnand %p530_p13, %p518_p8  ;;  %p539_p4 = por %p538_p5, %p537_p2 }
  0x1b   : > { %p533_p1 = pneg %p532_p0 }
  0x1d   : > { %p540_p3 = pnand %p539_p4, %p533_p1 }
  0x1f   : > { %543 = shalt.err (!%p540_p3)
}
  0x20   : > { %459 = dma.hbm_to_vmem [thread:$0]  (!%p642_p6), %s711_s1, 128, %s143_s20, [#allocation4]  }
  0x21   : > { %p720_p7 = scmp.ne.s32.totalorder %s717_s17, 0 }
  0x22   : > { %p721_p9 = scmp.ne.s32.totalorder (!%p720_p7), %s718_s18, 0 }
  0x23   : > { %168 = sbr.rel (%p720_p7) target bundleno = 325 (0x145), region = 32 }
  0x2a   : > { %557 = dma.done.wait (%p721_p9), [#allocation4], 128  }
  0x2b   : > { %559 = vsyncadd (%p721_p9), [#allocation4], 4294967168  ;;  %vm214_vm0 = vcmask 11264   ;;  %p196_p4 = scmp.lt.s32.totalorder %s562_s12, 1  ;;  %v573_v0 = vmov 0.0   ;;  %v574_v1 = vmov 1   ;;  %v231_v16 = vlaneseq }
  0x2c   : > { %215 = vst.msk [vmem:[#allocation2] sm:$0xf] %vm214_vm0, %v573_v0  ;;  %503 = vset.pattern.permute.xlu0 %v574_v1  ;;  %v575_v2 = vmov 4   ;;  %v676_v3 = vld [vmem:[#allocation3] sm:$0x3f]  ;;  %s576_s9 = smov 2  }
  0x2d   : > { %s727_s12 = smov (!%p196_p4, %s562_s12), 1  ;;  %505 = vset.pattern.permute.xlu1 %v575_v2  ;;  %243 = vperm.xlu0 %503, %v676_v3   ;;  %v577_v5 = vmov 2   ;;  %v578_v6 = vmov 5   ;;  %v579_v7 = vmov 7   ;;  %v580_v8 = vmov 8   ;;  %s587_s15 = smov 127  }
  0x2e   : > { %s448_s5 = sshll.u32 %s727_s12, 2  ;;  %v581_v9 = vmov 11   ;;  %v582_v10 = vmov 10   ;;  %v583_v11 = vmov 3   ;;  %v584_v12 = vmov 0   ;;  %s588_s17 = smov 126  }
  0x2f   : > { %s202_s8 = scalar_lea.vmem %s710_s0, %s448_s5  ;;  %v585_v13 = vmov 9   ;;  %v225_v14 = vld [vmem:[%s712_s2] sm:$0x3f]  ;;  %v586_v15 = vmov 6   ;;  %v232_v17 = vshrl.u32 %v231_v16, 7  ;;  %vm222_vm1 = vcmask 15360  }
  0x30   : > { %v217_v4 = vld [vmem:[%s202_s8] sm:$0xf]  ;;  %s449_s18 = sshll.u32 %s727_s12, 3  ;;  %vm352_vm2 = vcmask 128000  }
  0x31   : > { %219 = vrot.lane.b32.xlu1 %v217_v4, %s576_s9  ;;  %504 = vset.pattern.permute.xlu0 %v577_v5  ;;  %v233_v20 = vsub.s32 0, %v232_v17  ;;  %v264_v23 = vsub.s32 1, %v232_v17  ;;  %v294_v31 = vsub.s32 2, %v232_v17  ;;  %v324_v36 = vsub.s32 3, %v232_v17  ;;  %s209_s21 = scalar_lea.vmem %s713_s3, %s449_s18 }
  0x32   : > { %253 = vperm.xlu0 %504, %v676_v3  }
  0x33   : > { %v216_v19 = vld [vmem:[#allocation2] sm:$0xf] }
  0x35   : > { %273 = vperm.xlu1 %505, %v676_v3  }
  0x36   : > { %507 = vset.pattern.permute.xlu0 %v579_v7 }
  0x37   : > { %303 = vperm.xlu0 %507, %v676_v3  }
  0x39   : > { %506 = vset.pattern.permute.xlu1 %v578_v6 }
  0x3a   : > { %283 = vperm.xlu1 %506, %v676_v3  }
  0x3b   : > { %510 = vset.pattern.permute.xlu0 %v581_v9 }
  0x3c   : > { %343 = vperm.xlu0 %510, %v676_v3  }
  0x3e   : > { %508 = vset.pattern.permute.xlu1 %v580_v8 }
  0x3f   : > { %313 = vperm.xlu1 %508, %v676_v3  }
  0x40   : > { %512 = vset.pattern.permute.xlu0 %v583_v11 }
  0x41   : > { %267 = vperm.xlu0 %512, %v676_v3  }
  0x43   : > { %509 = vset.pattern.permute.xlu1 %v582_v10 }
  0x44   : > { %333 = vperm.xlu1 %509, %v676_v3  }
  0x45   : > { %514 = vset.pattern.permute.xlu0 %v585_v13 }
  0x48   : > { %511 = vset.pattern.permute.xlu1 %v584_v12 }
  0x49   : > { %237 = vperm.xlu1 %511, %v676_v3  }
  0x4d   : > { %228 = vperm.xlu1 %511, %v225_v14  }
  0x51   : > { %513 = vset.pattern.permute.xlu1 %v586_v15 }
  0x52   : > { %297 = vperm.xlu1 %513, %v676_v3  }
  0xa3   : > { %v220_v18 = vpop.permute.xlu1 %219 }
  0xa4   : > { %v223_v21 = vsel %vm222_vm1, %v216_v19, %v220_v18 }
  0xa5   : > { %v234_v22 = vrot.slane %v223_v21, %v233_v20  ;;  %v265_v26 = vrot.slane %v223_v21, %v264_v23  ;;  %v295_v35 = vrot.slane %v223_v21, %v294_v31  ;;  %v325_v41 = vrot.slane %v223_v21, %v324_v36 }
  0xac   : > { %v244_v24 = vpop.permute.xlu0 %243 }
  0xad   : > { %v246_v25 = vmul.f32 %v244_v24, %v234_v22 }
  0xaf   : > { %248 = vrot.lane.b32.xlu1 %v246_v25, %s587_s15 }
  0xb1   : > { %v254_v29 = vpop.permute.xlu0 %253 }
  0xb2   : > { %v256_v30 = vmul.f32 %v254_v29, %v234_v22 }
  0xb4   : > { %v274_v27 = vpop.permute.xlu1 %273  ;;  %258 = vrot.lane.b32.xlu0 %v256_v30, %s588_s17 }
  0xb5   : > { %v276_v28 = vmul.f32 %v274_v27, %v265_v26 }
  0xb6   : > { %v304_v34 = vpop.permute.xlu0 %303 }
  0xb7   : > { %278 = vrot.lane.b32.xlu1 %v276_v28, %s587_s15  ;;  %v306_v37 = vmul.f32 %v304_v34, %v295_v35 }
  0xb8   : > { %327 = vperm.xlu0 %514, %v676_v3  }
  0xb9   : > { %v284_v32 = vpop.permute.xlu1 %283 }
  0xba   : > { %v286_v33 = vmul.f32 %v284_v32, %v265_v26 }
  0xbb   : > { %v344_v40 = vpop.permute.xlu0 %343 }
  0xbc   : > { %288 = vrot.lane.b32.xlu1 %v286_v33, %s588_s17  ;;  %515 = vset.pattern.permute.xlu0 %v581_v9  ;;  %v346_v42 = vmul.f32 %v344_v40, %v325_v41 }
  0xbe   : > { %v314_v38 = vpop.permute.xlu1 %313 }
  0xbf   : > { %v316_v39 = vmul.f32 %v314_v38, %v295_v35 }
  0xc0   : > { %308 = vrot.lane.b32.xlu1 %v306_v37, %s587_s15  ;;  %v268_v50 = vpop.permute.xlu0 %267 }
  0xc1   : > { %318 = vrot.lane.b32.xlu0 %v316_v39, %s588_s17  ;;  %v270_v55 = vmul.f32 %v268_v50, %v265_v26 }
  0xc3   : > { %v334_v43 = vpop.permute.xlu1 %333 }
  0xc4   : > { %v336_v44 = vmul.f32 %v334_v43, %v325_v41 }
  0xc5   : > { %348 = vrot.lane.b32.xlu0 %v346_v42, %s588_s17 }
  0xc6   : > { %338 = vrot.lane.b32.xlu1 %v336_v44, %s587_s15 }
  0xc8   : > { %v238_v45 = vpop.permute.xlu1 %237 }
  0xc9   : > { %v240_v48 = vmul.f32 %v238_v45, %v234_v22 }
  0xcc   : > { %v229_v46 = vpop.permute.xlu1 %228 }
  0xcd   : > { %v241_v51 = vadd.f32 %v240_v48, %v229_v46 }
  0xd1   : > { %v298_v47 = vpop.permute.xlu1 %297 }
  0xd2   : > { %v300_v60 = vmul.f32 %v298_v47, %v295_v35 }
 0x121   : > { %v249_v49 = vpop.permute.xlu1 %248 }
 0x122   : > { %v251_v52 = vadd.f32 %v249_v49, %v241_v51 }
 0x126   : > { %v259_v54 = vpop.permute.xlu0 %258 }
 0x127   : > { %v261_v56 = vadd.f32 %v259_v54, %v251_v52 }
 0x129   : > { %v279_v53 = vpop.permute.xlu1 %278  ;;  %v271_v57 = vadd.f32 %v270_v55, %v261_v56 }
 0x12b   : > { %v281_v58 = vadd.f32 %v279_v53, %v271_v57 }
 0x12e   : > { %v289_v59 = vpop.permute.xlu1 %288 }
 0x12f   : > { %v291_v61 = vadd.f32 %v289_v59, %v281_v58 }
 0x131   : > { %v301_v62 = vadd.f32 %v300_v60, %v291_v61 }
 0x132   : > { %v309_v0 = vpop.permute.xlu1 %308 }
 0x133   : > { %v311_v1 = vadd.f32 %v309_v0, %v301_v62 }
 0x137   : > { %v328_v63 = vpop.permute.xlu0 %327 }
 0x138   : > { %v330_v3 = vmul.f32 %v328_v63, %v325_v41  ;;  %v339_v6 = vpop.permute.xlu1 %338 }
 0x13b   : > { %v319_v2 = vpop.permute.xlu0 %318 }
 0x13c   : > { %v321_v4 = vadd.f32 %v319_v2, %v311_v1 }
 0x13e   : > { %v331_v5 = vadd.f32 %v330_v3, %v321_v4 }
 0x13f   : > { %v349_v8 = vpop.permute.xlu0 %348 }
 0x140   : > { %v341_v7 = vadd.f32 %v339_v6, %v331_v5 }
 0x142   : > { %v351_v9 = vadd.f32 %v349_v8, %v341_v7 }
 0x144   : > { %353 = vst.msk [vmem:[%s209_s21] sm:$0x3f] %vm352_vm2, %v351_v9 }
 0x145 PF: > { %s14_s14 = sadd.s32 1, %s570_s14   ;;  %s722_s12 = smov %s566_s13 }
 0x146   : > { %p11_p3 = scmp.ge.s32.totalorder %s14_s14, 4   ;;  %s723_s13 = smov %s725_s16 }
 0x148   :  { %13 = sbr.rel (!%p11_p3) target bundleno = 2 (0x2), region = 71 }
 0x14f   :  { %379 = vsyncpa [#allocation4], 1 }
 0x150   :  { %381 = vsyncpa [#allocation4 + $0x1], 1 }

</bundles_post_ra>
